<compile_context>
chip_gen: v5e
topology: v5e:2x2
jax: 0.10.0
libtpu: 0.0.40
codegen_flags: <defaults>
</compile_context>

<pallas_src>
import functools

import jax
import jax.numpy as jnp
from jax.experimental import pallas as pl
from jax.experimental.pallas import tpu as pltpu


def _se_kernel(x_ref, w1_ref, b1_ref, w2_ref, b2_ref, o_ref, *, inv_hw):
    """SE forward for a (Bt, C, HW_pad) slab.

    x_ref : (Bt, C, HW_pad)  input block (spatial axis zero-padded to 128*k)
    w1_ref: (C, RD)          conv_reduce weight, pre-transposed
    b1_ref: (1, RD)          conv_reduce bias
    w2_ref: (RD, C)          conv_expand weight, pre-transposed
    b2_ref: (1, C)           conv_expand bias
    o_ref : (Bt, C, HW_pad)  output block
    """
    # Global average pool == lane reduction.  The f32 cast fuses per-vreg into
    # the reduction; no whole-tile f32 copy is kept live across the MLP.
    # Padded lanes are zeros, so sum * (1/HW_true) is exact.
    s = jnp.sum(x_ref[...].astype(jnp.float32), axis=-1) * inv_hw      # (Bt, C)

    # conv_reduce (1x1) + ReLU, conv_expand (1x1) + sigmoid (sigmoid -> EUP).
    h = jnp.maximum(
        jnp.dot(s, w1_ref[...], preferred_element_type=jnp.float32) + b1_ref[...],
        0.0,
    )                                                                   # (Bt, RD)
    g = jax.nn.sigmoid(
        jnp.dot(h, w2_ref[...], preferred_element_type=jnp.float32) + b2_ref[...]
    )                                                                   # (Bt, C)

    # Re-read x and scale per channel; the multiply stays in the input dtype so
    # the dominant elementwise phase is as cheap as possible (bf16 on v6e/v7x).
    o_ref[...] = x_ref[...] * g.astype(o_ref.dtype)[:, :, None]


def _pick_batch_tile(B, per_batch_bytes, budget_bytes=8 << 20):
    """Largest divisor of B whose slab fits a conservative VMEM budget."""
    max_bt = max(1, budget_bytes // max(per_batch_bytes, 1))
    bt = 1
    for d in range(1, B + 1):
        if B % d == 0 and d <= max_bt:
            bt = d
    return bt


def se_forward(x_nchw, w_reduce, b_reduce, w_expand, b_expand):
    """x_nchw: (B, C, H, W).  1x1-conv weights given as 2-D matrices:
    w_reduce: (RD, C), b_reduce: (RD,), w_expand: (C, RD), b_expand: (C,)."""
    B, C, H, W = x_nchw.shape
    HW = H * W
    RD = w_reduce.shape[0]
    dtype = x_nchw.dtype
    itemsize = jnp.dtype(dtype).itemsize

    # Lane-dense spatial axis: pad HW to a multiple of 128 so every store of
    # x*g is an unmasked full-lane vst (biggest single measured lever).
    HW_pad = ((HW + 127) // 128) * 128
    x_flat = x_nchw.reshape(B, C, HW)
    if HW_pad != HW:
        x_flat = jnp.pad(x_flat, ((0, 0), (0, 0), (0, HW_pad - HW)))

    # Multiple batch elements per grid step (fills sublanes for small C,
    # amortizes ~0.35us/step overhead, batches the tiny MLP into one dot).
    bt = _pick_batch_tile(B, C * HW_pad * itemsize)
    nb = B // bt

    # Pre-transpose weights in the wrapper -> no in-kernel .T / XLU work.
    w1 = jnp.asarray(w_reduce, jnp.float32).T            # (C, RD)
    w2 = jnp.asarray(w_expand, jnp.float32).T            # (RD, C)
    b1 = jnp.asarray(b_reduce, jnp.float32).reshape(1, RD)
    b2 = jnp.asarray(b_expand, jnp.float32).reshape(1, C)

    # VMEM budget: double-buffered input + output slabs plus (tiny) weights.
    slab = bt * C * HW_pad * itemsize
    needed = 4 * slab + 8 * (C * RD + RD + C) * 4 + (1 << 20)
    vmem_limit = int(min(max(32 << 20, needed), 100 << 20))

    cost = pl.CostEstimate(
        flops=2 * B * C * HW + 4 * B * C * RD,
        transcendentals=B * C,
        bytes_accessed=2 * B * C * HW_pad * itemsize,
    )

    kernel = functools.partial(_se_kernel, inv_hw=1.0 / float(HW))

    out_flat = pl.pallas_call(
        kernel,
        out_shape=jax.ShapeDtypeStruct((B, C, HW_pad), dtype),
        grid_spec=pltpu.PrefetchScalarGridSpec(
            num_scalar_prefetch=0,
            grid=(nb,),
            in_specs=[
                pl.BlockSpec((bt, C, HW_pad), lambda b: (b, 0, 0)),   # x
                pl.BlockSpec((C, RD), lambda b: (0, 0)),              # w1
                pl.BlockSpec((1, RD), lambda b: (0, 0)),              # b1
                pl.BlockSpec((RD, C), lambda b: (0, 0)),              # w2
                pl.BlockSpec((1, C), lambda b: (0, 0)),               # b2
            ],
            out_specs=pl.BlockSpec((bt, C, HW_pad), lambda b: (b, 0, 0)),
        ),
        compiler_params=pltpu.CompilerParams(
            dimension_semantics=("parallel",),
            vmem_limit_bytes=vmem_limit,
        ),
        cost_estimate=cost,
    )(x_flat, w1, b1, w2, b2)

    if HW_pad != HW:
        out_flat = out_flat[:, :, :HW]
    return out_flat.reshape(B, C, H, W)


def _reference(x_nchw, w_reduce, b_reduce, w_expand, b_expand):
    """Pure-JAX reference matching the PyTorch forward (bksz=(1,1))."""
    xf = x_nchw.astype(jnp.float32)
    s = jnp.mean(xf, axis=(2, 3))                              # (B, C)
    h = jnp.maximum(s @ jnp.asarray(w_reduce, jnp.float32).T + b_reduce, 0.0)
    g = jax.nn.sigmoid(h @ jnp.asarray(w_expand, jnp.float32).T + b_expand)
    return x_nchw * g.astype(x_nchw.dtype)[:, :, None, None]


def _run_case(key, B, C, H, W, dtype, atol, rtol):
    RD = max(1, round(C * 0.25))
    kx, k1, k2, k3, k4 = jax.random.split(key, 5)
    x = jax.random.normal(kx, (B, C, H, W), dtype=jnp.float32).astype(dtype)
    w_reduce = jax.random.normal(k1, (RD, C), jnp.float32) * (1.0 / jnp.sqrt(C))
    b_reduce = jax.random.normal(k2, (RD,), jnp.float32) * 0.1
    w_expand = jax.random.normal(k3, (C, RD), jnp.float32) * (1.0 / jnp.sqrt(RD))
    b_expand = jax.random.normal(k4, (C,), jnp.float32) * 0.1

    out = se_forward(x, w_reduce, b_reduce, w_expand, b_expand)
    out = jax.block_until_ready(out)
    ref = _reference(x, w_reduce, b_reduce, w_expand, b_expand)

    assert out.shape == (B, C, H, W)
    assert out.dtype == dtype
    assert jnp.allclose(out.astype(jnp.float32), ref.astype(jnp.float32),
                        atol=atol, rtol=rtol), f"mismatch for {dtype} {H}x{W}"


if __name__ == "__main__":
    key = jax.random.PRNGKey(0)
    k0, k1, k2 = jax.random.split(key, 3)

    # f32, HW already a multiple of 128 (in_chs=8, ratio=0.25 -> rd=2).
    _run_case(k0, B=2, C=8, H=16, W=16, dtype=jnp.float32, atol=1e-5, rtol=1e-5)
    # f32, HW = 196 (not a multiple of 128) -> exercises lane padding path.
    _run_case(k1, B=2, C=8, H=14, W=14, dtype=jnp.float32, atol=1e-5, rtol=1e-5)
    # bf16 input with padded spatial axis; gate multiply stays in bf16.
    _run_case(k2, B=2, C=8, H=14, W=14, dtype=jnp.bfloat16, atol=2e-2, rtol=2e-2)

    print("KERNEL_OK")
</pallas_src>

<mosaic_0001>
module attributes {stable_mosaic.version = 11 : i64} {
  func.func @_se_kernel(%arg0: i32, %arg1: memref<2x8x256xf32, #tpu.memory_space<vmem>>, %arg2: memref<8x2xf32, #tpu.memory_space<vmem>>, %arg3: memref<1x2xf32, #tpu.memory_space<vmem>>, %arg4: memref<2x8xf32, #tpu.memory_space<vmem>>, %arg5: memref<1x8xf32, #tpu.memory_space<vmem>>, %arg6: memref<2x8x256xf32, #tpu.memory_space<vmem>>) attributes {dimension_semantics = [#tpu.dimension_semantics<parallel>], iteration_bounds = array<i64: 1>, scalar_prefetch = 0 : i64, scratch_operands = 0 : i64, tpu.core_type = #tpu.core_type<tc>, window_params = [{transform_indices = @transform_0, window_bounds = array<i64: 2, 8, 256>}, {pipeline_mode = #tpu.pipeline_mode<synchronous>, transform_indices = @transform_1, window_bounds = array<i64: 8, 2>}, {pipeline_mode = #tpu.pipeline_mode<synchronous>, transform_indices = @transform_2, window_bounds = array<i64: 1, 2>}, {pipeline_mode = #tpu.pipeline_mode<synchronous>, transform_indices = @transform_3, window_bounds = array<i64: 2, 8>}, {pipeline_mode = #tpu.pipeline_mode<synchronous>, transform_indices = @transform_4, window_bounds = array<i64: 1, 8>}, {transform_indices = @transform_5, window_bounds = array<i64: 2, 8, 256>}]} {
    %c0 = arith.constant 0 : index
    %c0_0 = arith.constant 0 : index
    %c0_1 = arith.constant 0 : index
    %0 = vector.load %arg1[%c0, %c0_0, %c0_1] : memref<2x8x256xf32, #tpu.memory_space<vmem>>, vector<2x8x256xf32>
    %cst = arith.constant dense<0.000000e+00> : vector<2x8xf32>
    %1 = vector.multi_reduction <add>, %0, %cst [2] : vector<2x8x256xf32> to vector<2x8xf32>
    %cst_2 = arith.constant 3.906250e-03 : f32
    %2 = vector.broadcast %cst_2 : f32 to vector<2x8xf32>
    %3 = arith.mulf %1, %2 : vector<2x8xf32>
    %c0_3 = arith.constant 0 : index
    %c0_4 = arith.constant 0 : index
    %4 = vector.load %arg2[%c0_3, %c0_4] : memref<8x2xf32, #tpu.memory_space<vmem>>, vector<8x2xf32>
    %cst_5 = arith.constant dense<0.000000e+00> : vector<2x2xf32>
    %5 = tpu.matmul %3, %4, %cst_5 {dimension_numbers = #tpu.dot_dimension_numbers<[1], [0], [0], [1], [0, 0, 1, 1], [], []>} : vector<2x8xf32>, vector<8x2xf32>, vector<2x2xf32> -> vector<2x2xf32>
    %c0_6 = arith.constant 0 : index
    %c0_7 = arith.constant 0 : index
    %6 = vector.load %arg3[%c0_6, %c0_7] : memref<1x2xf32, #tpu.memory_space<vmem>>, vector<1x2xf32>
    %7 = vector.broadcast %6 : vector<1x2xf32> to vector<2x2xf32>
    %8 = arith.addf %5, %7 : vector<2x2xf32>
    %cst_8 = arith.constant 0.000000e+00 : f32
    %9 = vector.broadcast %cst_8 : f32 to vector<2x2xf32>
    %10 = arith.maximumf %8, %9 : vector<2x2xf32>
    %c0_9 = arith.constant 0 : index
    %c0_10 = arith.constant 0 : index
    %11 = vector.load %arg4[%c0_9, %c0_10] : memref<2x8xf32, #tpu.memory_space<vmem>>, vector<2x8xf32>
    %cst_11 = arith.constant dense<0.000000e+00> : vector<2x8xf32>
    %12 = tpu.matmul %10, %11, %cst_11 {dimension_numbers = #tpu.dot_dimension_numbers<[1], [0], [0], [1], [0, 0, 1, 1], [], []>} : vector<2x2xf32>, vector<2x8xf32>, vector<2x8xf32> -> vector<2x8xf32>
    %c0_12 = arith.constant 0 : index
    %c0_13 = arith.constant 0 : index
    %13 = vector.load %arg5[%c0_12, %c0_13] : memref<1x8xf32, #tpu.memory_space<vmem>>, vector<1x8xf32>
    %14 = vector.broadcast %13 : vector<1x8xf32> to vector<2x8xf32>
    %15 = arith.addf %12, %14 : vector<2x8xf32>
    %16 = arith.negf %15 : vector<2x8xf32>
    %17 = math.exp %16 : vector<2x8xf32>
    %cst_14 = arith.constant 1.000000e+00 : f32
    %18 = vector.broadcast %cst_14 : f32 to vector<2x8xf32>
    %19 = arith.addf %18, %17 : vector<2x8xf32>
    %20 = arith.divf %18, %19 : vector<2x8xf32>
    %c0_15 = arith.constant 0 : index
    %c0_16 = arith.constant 0 : index
    %c0_17 = arith.constant 0 : index
    %21 = vector.load %arg1[%c0_15, %c0_16, %c0_17] : memref<2x8x256xf32, #tpu.memory_space<vmem>>, vector<2x8x256xf32>
    %22 = vector.shape_cast %20 : vector<2x8xf32> to vector<2x8x1xf32>
    %23 = vector.broadcast %22 : vector<2x8x1xf32> to vector<2x8x256xf32>
    %24 = arith.mulf %21, %23 : vector<2x8x256xf32>
    %c0_18 = arith.constant 0 : index
    %c0_19 = arith.constant 0 : index
    %c0_20 = arith.constant 0 : index
    %25 = vector.load %arg6[%c0_18, %c0_19, %c0_20] : memref<2x8x256xf32, #tpu.memory_space<vmem>>, vector<2x8x256xf32>
    tpu.vector_store %arg6[%c0_18, %c0_19, %c0_20], %24 {strides = array<i32>} : memref<2x8x256xf32, #tpu.memory_space<vmem>>, vector<2x8x256xf32>,
    return
  }
  func.func @transform_0(%arg0: i32) -> (i32, i32, i32) {
    %c0_i32 = arith.constant 0 : i32
    %c0_i32_0 = arith.constant 0 : i32
    %c0_i32_1 = arith.constant 0 : i32
    return %arg0, %c0_i32, %c0_i32_0 : i32, i32, i32
  }
  func.func @transform_1(%arg0: i32) -> (i32, i32) {
    %c0_i32 = arith.constant 0 : i32
    %c0_i32_0 = arith.constant 0 : i32
    %c0_i32_1 = arith.constant 0 : i32
    return %c0_i32, %c0_i32_0 : i32, i32
  }
  func.func @transform_2(%arg0: i32) -> (i32, i32) {
    %c0_i32 = arith.constant 0 : i32
    %c0_i32_0 = arith.constant 0 : i32
    %c0_i32_1 = arith.constant 0 : i32
    return %c0_i32, %c0_i32_0 : i32, i32
  }
  func.func @transform_3(%arg0: i32) -> (i32, i32) {
    %c0_i32 = arith.constant 0 : i32
    %c0_i32_0 = arith.constant 0 : i32
    %c0_i32_1 = arith.constant 0 : i32
    return %c0_i32, %c0_i32_0 : i32, i32
  }
  func.func @transform_4(%arg0: i32) -> (i32, i32) {
    %c0_i32 = arith.constant 0 : i32
    %c0_i32_0 = arith.constant 0 : i32
    %c0_i32_1 = arith.constant 0 : i32
    return %c0_i32, %c0_i32_0 : i32, i32
  }
  func.func @transform_5(%arg0: i32) -> (i32, i32, i32) {
    %c0_i32 = arith.constant 0 : i32
    %c0_i32_0 = arith.constant 0 : i32
    %c0_i32_1 = arith.constant 0 : i32
    return %arg0, %c0_i32, %c0_i32_0 : i32, i32, i32
  }
}

</mosaic_0001>

<bundles_post_ra>
// kernel: tpu_custom_call.1
= control target key start
LH: loop header
LB: loop body
LE: loop exit
PB: predicated region body
PF: predicated region fallthrough
CT: control target
= control target key end

     0   :  { %10 = vsyncpa [#allocation3], 0  ;;  %s313_s0 = inlined_call_operand.hbm [shape: f32[2,8,256], index: 0, kind: input, shape index: {}]   ;;  %s314_s1 = inlined_call_operand.vmem [shape: f32[8,2], index: 1, kind: input, shape index: {}]   ;;  %s315_s2 = inlined_call_operand.vmem [shape: f32[1,2], index: 2, kind: input, shape index: {}]   ;;  %s316_s3 = inlined_call_operand.vmem [shape: f32[2,8], index: 3, kind: input, shape index: {}]   ;;  %s317_s4 = inlined_call_operand.vmem [shape: f32[1,8], index: 4, kind: input, shape index: {}]   ;;  %s318_s5 = inlined_call_operand.hbm [shape: f32[2,8,256], index: 5, kind: output, shape index: {}]  }
   0x1   :  { %11 = vsyncpa [#allocation4], 0  ;;  %s16_s20 = sshll.u32 %s313_s0, 4  ;;  %s247_s21 = smov [#allocation2]   ;;  %s17_s20 = int_to_ptr.hbm [resolvable:$true] %s16_s20 }
   0x2   :  { %s18_s22 = sshll.u32 %s247_s21, 4  ;;  %s248_s23 = smov 256   ;;  %s19_s22 = int_to_ptr.vmem [resolvable:$true] %s18_s22 }
   0x3   :  { %s249_s24 = smov 16  }
   0x4   :  { %24 = dma.hbm_to_vmem [thread:$0]  %s17_s20, 512, %s19_s22, [#allocation3], %s248_s23, %s248_s23, %s249_s24  }
   0x5   :  { %243 = dma.done.wait [#allocation3], 512  }
   0x6   :  { %244 = vsyncadd [#allocation3], 4294966784  ;;  %v37_v0 = vld [vmem:[#allocation2] sm:$0xff]  ;;  %v38_v1 = vld [vmem:[#allocation2 + $0x8] sm:$0xff]  ;;  %v56_v8 = vlaneseq  ;;  %vm60_vm0 = vcmask 1041409   ;;  %vm62_vm1 = vcmask 64512  }
   0x7   :  { %v41_v2 = vadd.f32 %v38_v1, %v37_v0  ;;  %v287_v3 = vld [vmem:[#allocation2 + $0x10] sm:$0xff]  ;;  %v289_v4 = vld [vmem:[#allocation2 + $0x18] sm:$0xff]  ;;  %v49_v6 = vld [vmem:[%s314_s1] sm:$0xff]  ;;  %vm95_vm2 = vcmask 1041408   ;;  %vm91_vm3 = vcmask 15360   ;;  %s166_s7 = sshll.u32 %s318_s5, 4  ;;  %s167_s7 = int_to_ptr.hbm [resolvable:$true] %s166_s7 }
   0x8   :  { %v44_v5 = vadd.f32 %v289_v4, %v287_v3  ;;  %80 = vmatpush.msra.mxu0 %v49_v6  ;;  %v57_v9 = vand.u32 127, %v56_v8  ;;  %v86_v16 = vld [vmem:[%s316_s3] sm:$0x3]  ;;  %v140_v21 = vshrl.u32 %v56_v8, 7 }
   0x9   :  { %42 = vadd.xlane.f32.xlu0 %v41_v2  ;;  %180 = vmatpush.msk.msra.mxu1 %vm95_vm2, %v86_v16  ;;  %v189_v17 = vld [vmem:[%s315_s2] ss:$0 sm:$0xff]  ;;  %s250_s2 = smov [#allocation5]  }
   0xa   :  { %187 = vset.pattern.permute.xlu1 %v140_v21  ;;  %188 = vset.pattern.permute.xlu0 %v140_v21  ;;  %v190_v22 = vld [vmem:[%s317_s4] ss:$0 sm:$0xff]  ;;  %s164_s3 = sshll.u32 %s250_s2, 4  ;;  %s165_s3 = int_to_ptr.vmem [resolvable:$true] %s164_s3 }
  0x11   :  { %45 = vadd.xlane.f32.xlu0 %v44_v5 }
  0x7c   :  { %v43_v7 = vpop.xlane.xlu0 %42 }
  0x7d   :  { %v47_v10 = vmul.f32 0.00390625, %v43_v7 }
  0x7f   :  { %v58_v13 = vperm.slane %v47_v10, %v57_v9 }
  0x84   :  { %v46_v11 = vpop.xlane.xlu0 %45 }
  0x85   :  { %v48_v12 = vmul.f32 0.00390625, %v46_v11 }
  0x87   :  { %v59_v14 = vperm.slane %v48_v12, %v57_v9 }
  0x89   :  { %v61_v15 = vsel %vm60_vm0, %v59_v14, %v58_v13 }
  0x8a   :  { %179 = vmatmul.msk.f32.vlgmr.msra.gmra.mxu0 %vm62_vm1, %v61_v15 }
 0x107   :  { %v82_v18 = vpop.f32.mrf.mxu0 }
 0x108   :  { %v83_v19 = vadd.f32 %v189_v17, %v82_v18 }
 0x10a   :  { %v85_v20 = vmax.f32 %v83_v19, 0.0 }
 0x10c   :  { %181 = vmatmul.msk.f32.vlgmr.msra.gmra.mxu1 %vm91_vm3, %v85_v20 }
 0x189   :  { %v116_v23 = vpop.f32.mrf.mxu1 }
 0x18a   :  { %v117_v24 = vadd.f32 %v190_v22, %v116_v23 }
 0x18c   :  { %v182_v25 = vmul.f32 -1.442695, %v117_v24 }
 0x18e   :  { %191 = vpow2.f32 %v182_v25 }
 0x194   :  { %v192_v26 = vpop.eup %191 }
 0x195   :  { %v122_v27 = vadd.f32 1.0, %v192_v26 }
 0x197   :  { %193 = vrcp.f32 %v122_v27  ;;  %v134_v31 = vand.u32 2147483648, %v122_v27  ;;  %v132_v33 = vand.u32 2147483647, %v122_v27  ;;  %vm128_vm5 = vweird.f32 %v122_v27 }
 0x199   :  { %v135_v35 = vor.u32 1.1754944e-38, %v134_v31  ;;  %vm133_vm7 = vcmp.eq.f32.partialorder %v132_v33, 8.507059e+37 }
 0x19d   :  { %v194_v28 = vpop.eup %193 }
 0x19e   :  { %v124_v29 = vmul.f32 %v194_v28, %v122_v27  ;;  %vm129_vm4 = vweird.f32 %v194_v28 }
 0x19f   :  { %vm130_vm6 = vmor %vm128_vm5, %vm129_vm4 }
 0x1a0   :  { %v125_v30 = vsub.f32 1.0, %v124_v29 }
 0x1a2   :  { %v126_v32 = vmul.f32 %v194_v28, %v125_v30 }
 0x1a4   :  { %v127_v34 = vadd.f32 %v194_v28, %v126_v32 }
 0x1a6   :  { %v131_v36 = vsel %vm130_vm6, %v194_v28, %v127_v34 }
 0x1a7   :  { %v136_v37 = vsel %vm133_vm7, %v135_v35, %v131_v36 }
 0x1a8   :  { %v138_v38 = vperm.slane %v136_v37, 0  ;;  %v145_v39 = vperm.slane %v136_v37, 1 }
 0x1aa   :  { %143 = vperm.xlu1 %187, %v138_v38  }
 0x1b2   :  { %150 = vperm.xlu1 %187, %v145_v39  }
 0x21c   :  { %v144_v40 = vpop.permute.xlu1 %143 }
 0x21d   :  { %v152_v41 = vmul.f32 %v144_v40, %v37_v0  ;;  %v153_v42 = vmul.f32 %v144_v40, %v38_v1 }
 0x21f   :  { %156 = vst [vmem:[#allocation5] sm:$0xff] %v152_v41 }
 0x220   :  { %157 = vst [vmem:[#allocation5 + $0x8] sm:$0xff] %v153_v42 }
 0x224   :  { %v151_v43 = vpop.permute.xlu1 %150 }
 0x225   :  { %v154_v44 = vmul.f32 %v151_v43, %v287_v3  ;;  %v155_v45 = vmul.f32 %v151_v43, %v289_v4 }
 0x227   :  { %158 = vst [vmem:[#allocation5 + $0x10] sm:$0xff] %v154_v44 }
 0x228   :  { %159 = vst [vmem:[#allocation5 + $0x18] sm:$0xff] %v155_v45 }
 0x229   :  { %172 = dma.vmem_to_hbm [thread:$0]  %s165_s3, 512, %s167_s7, [#allocation4], %s248_s23, %s248_s23, %s249_s24  }
 0x22a   :  { %245 = dma.done.wait [#allocation4], 512  }
 0x22b   :  { %246 = vsyncadd [#allocation4], 4294966784 }
 0x22c   :  { %177 = vsyncpa [#allocation3], 1 }
 0x22d   :  { %178 = vsyncpa [#allocation4], 1 }

</bundles_post_ra>
